<compile_context>
chip_gen: v7x
topology: tpu7x:2x2x1
jax: 0.10.0
libtpu: 0.0.40
codegen_flags: <defaults>
</compile_context>

<pallas_src>
import jax
import jax.numpy as jnp
from jax.experimental import pallas as pl
from jax.experimental.pallas import tpu as pltpu

MAX_CHANNELS = 100
TAG_K = 3            # PyG TAGConv default number of hops
LANE = 128
HOP_SLOT = 32        # per-hop lane slot for the merged W2 (4 hops x 32 = 128)


def _round_up(v, m):
    return (v + m - 1) // m * m


def _make_l2tag_kernel(k_hops, in_c, hop_pad):
    """Fused two-layer TAGConv kernel (static k_hops / in_c / hop_pad)."""

    def kernel(a_ref, x_ref, w1_ref, b1_ref, w2_ref, b2_ref, o_ref, xcat_ref):
        a = a_ref[...]                                   # [N, N]     bf16

        # -------- layer 1: TAGConv(in_c -> hid), propagate-first --------
        # Pack x_0 .. x_K side-by-side: xcat[:, k*in_c:(k+1)*in_c] = A_hat^k x.
        xk = x_ref[...]                                  # [N, in_c]  bf16
        xcat_ref[:, 0:in_c] = xk
        for k in range(1, k_hops + 1):
            xk = jnp.dot(a, xk,
                         preferred_element_type=jnp.float32).astype(jnp.bfloat16)
            xcat_ref[:, k * in_c:(k + 1) * in_c] = xk
        # ONE depth-(K+1)*in_c contraction replaces K+1 depth-in_c ones.
        acc1 = jnp.dot(xcat_ref[...], w1_ref[...],       # [N, hid_pad] f32
                       preferred_element_type=jnp.float32)
        h = jnp.maximum(acc1 + b1_ref[...], 0.0)         # bias + ReLU in f32
        # TODO(synk): training-mode Dropout(p=0.1) not implemented (identity in
        # eval mode; would need pltpu.prng_seed / prng_random_bits in-kernel).
        h = h.astype(jnp.bfloat16)                       # [N, hid_pad]

        # -------- layer 2: TAGConv(hid -> out), linear-first + Horner ----
        # y[:, k*hop_pad : k*hop_pad+out_c] = h @ W2_k  (32-lane slot per hop).
        y = jnp.dot(h, w2_ref[...],                      # [N, (K+1)*hop_pad] f32
                    preferred_element_type=jnp.float32)
        acc2 = y[:, k_hops * hop_pad:(k_hops + 1) * hop_pad]
        for k in range(k_hops - 1, -1, -1):
            prop = jnp.dot(a, acc2.astype(jnp.bfloat16),
                           preferred_element_type=jnp.float32)
            acc2 = y[:, k * hop_pad:(k + 1) * hop_pad] + prop
        o_ref[...] = jnp.maximum(acc2 + b2_ref[...], 0.0).astype(o_ref.dtype)

    return kernel


def l2_tag_conv(x, a_hat, w1, b1, w2, b2):
    """Forward of L2TAGConv (inference mode).

    x:     [N, in_c] f32
    a_hat: [N, N] normalized dense adjacency (bf16 or f32), no self loops
    w1: [K+1, in_c, hid] f32,  b1: [1, hid] f32
    w2: [K+1, hid, out_c] f32, b2: [1, out_c] f32
    """
    n, in_c = x.shape
    k1, _, hid = w1.shape
    k2, _, out_c = w2.shape
    assert k1 == k2
    k_hops = k1 - 1
    hid_pad = _round_up(hid, LANE)        # 400 -> 512 : lane-dense hidden
    hop_pad = _round_up(out_c, HOP_SLOT)  # 4   -> 32  : per-hop output slot

    # ---- wrapper-side weight packing / padding / bf16 casts (done once) ----
    # W1 stack -> single [(K+1)*in_c, hid_pad] matrix (row block k == hop k).
    w1_flat = jnp.zeros((k1 * in_c, hid_pad), jnp.float32)
    for k in range(k1):
        w1_flat = w1_flat.at[k * in_c:(k + 1) * in_c, :hid].set(w1[k])
    w1_flat = w1_flat.astype(jnp.bfloat16)
    b1_p = jnp.zeros((1, hid_pad), jnp.float32).at[:, :hid].set(b1)

    # W2 stack -> [hid_pad, (K+1)*hop_pad]; each hop gets a 32-lane slot.
    w2_cat = jnp.zeros((hid_pad, k2 * hop_pad), jnp.float32)
    for k in range(k2):
        w2_cat = w2_cat.at[:hid, k * hop_pad:k * hop_pad + out_c].set(w2[k])
    w2_cat = w2_cat.astype(jnp.bfloat16)
    b2_p = jnp.zeros((1, hop_pad), jnp.float32).at[:, :out_c].set(b2)

    a_bf = a_hat if a_hat.dtype == jnp.bfloat16 else a_hat.astype(jnp.bfloat16)
    x_bf = x.astype(jnp.bfloat16)

    # Explicit VMEM budget: default scoped VMEM is only 16 MiB on v5e /
    # 32 MiB on v6e-v7x; size it from the actual operands (double-buffered).
    total_bytes = (a_bf.size * 2 + x_bf.size * 2 + w1_flat.size * 2
                   + w2_cat.size * 2 + b1_p.size * 4 + b2_p.size * 4
                   + n * hop_pad * 4 + n * k1 * in_c * 2)
    vmem_limit = int(min(112 * 1024 * 1024,
                         max(32 * 1024 * 1024, 2 * total_bytes + (4 << 20))))

    out_padded = pl.pallas_call(
        _make_l2tag_kernel(k_hops, in_c, hop_pad),
        out_shape=jax.ShapeDtypeStruct((n, hop_pad), jnp.float32),
        grid=(1,),
        in_specs=[
            pl.BlockSpec((n, n), lambda i: (0, 0)),                     # A_hat
            pl.BlockSpec((n, in_c), lambda i: (0, 0)),                  # X
            pl.BlockSpec((k1 * in_c, hid_pad), lambda i: (0, 0)),       # W1 merged
            pl.BlockSpec((1, hid_pad), lambda i: (0, 0)),               # b1
            pl.BlockSpec((hid_pad, k2 * hop_pad), lambda i: (0, 0)),    # W2 merged
            pl.BlockSpec((1, hop_pad), lambda i: (0, 0)),               # b2
        ],
        out_specs=pl.BlockSpec((n, hop_pad), lambda i: (0, 0)),
        scratch_shapes=[pltpu.VMEM((n, k1 * in_c), jnp.bfloat16)],      # x_0..x_K
        compiler_params=pltpu.CompilerParams(
            dimension_semantics=("arbitrary",),
            vmem_limit_bytes=vmem_limit),
    )(a_bf, x_bf, w1_flat, b1_p, w2_cat, b2_p)
    # TODO(synk): for large N, row-tile A_hat over a "parallel" grid axis
    # (TM ~ 256 on v6e/v7x, 128 on v5e) so the A_hat DMA pipelines with compute
    # and both v7x TensorCores get work; keep the small full-graph feature
    # slabs resident in VMEM scratch and loop hops inside the body.
    return out_padded[:, :out_c]


def gcn_norm_dense(edge_index, num_nodes):
    """Dense D^{-1/2} A D^{-1/2}, no self loops (matches PyG gcn_norm for TAGConv).

    A_hat[i, j] = deg^{-1/2}[i] * deg^{-1/2}[j] for every edge j -> i, so that
    propagation is A_hat @ X.  Returned directly in bf16 (kernel operand dtype)
    so no separate f32 -> bf16 cast pass touches the N^2 array.
    """
    row, col = edge_index                 # row = source, col = target
    a = jnp.zeros((num_nodes, num_nodes), jnp.float32).at[col, row].add(1.0)
    deg = a.sum(axis=1)
    safe_deg = jnp.where(deg > 0, deg, 1.0)
    d_inv_sqrt = jnp.where(deg > 0, safe_deg ** -0.5, 0.0)
    return (d_inv_sqrt[:, None] * a * d_inv_sqrt[None, :]).astype(jnp.bfloat16)


def l2_tag_conv_ref(x, a_hat, w1, b1, w2, b2):
    """Pure-JAX f32 reference (same math, no padding / bf16)."""
    def tag(h, ws, b):
        out = h @ ws[0]
        hk = h
        for k in range(1, ws.shape[0]):
            hk = a_hat @ hk
            out = out + hk @ ws[k]
        return jax.nn.relu(out + b)
    h = tag(x, w1, b1)
    return tag(h, w2, b2)


if __name__ == "__main__":
    key = jax.random.PRNGKey(0)
    N, IN_C, OUT_C = 32, 16, 4
    HID = MAX_CHANNELS * OUT_C            # conv1 width = 400 (padded to 512 in-kernel)

    k_x, k_w1, k_w2 = jax.random.split(key, 3)
    x = jax.random.normal(k_x, (N, IN_C), jnp.float32)

    # Deterministic undirected graph: ring + chords (both directions).
    src = jnp.arange(N)
    ring = jnp.stack([src, (src + 1) % N])
    chords = jnp.stack([src, (src + 5) % N])
    edge_index = jnp.concatenate(
        [ring, ring[::-1], chords, chords[::-1]], axis=1)   # [2, 4N]

    def glorot(k, shape):
        lim = (6.0 / (shape[-2] + shape[-1])) ** 0.5
        return jax.random.uniform(k, shape, jnp.float32, -lim, lim)

    # conv1: TAGConv(IN_C, MAX_CHANNELS*OUT_C), conv2: TAGConv(HID, OUT_C)
    w1 = glorot(k_w1, (TAG_K + 1, IN_C, HID))
    b1 = jnp.zeros((1, HID), jnp.float32)     # PyG zero-inits TAGConv bias
    w2 = glorot(k_w2, (TAG_K + 1, HID, OUT_C))
    b2 = jnp.zeros((1, OUT_C), jnp.float32)

    a_hat = gcn_norm_dense(edge_index, N)     # bf16

    out = l2_tag_conv(x, a_hat, w1, b1, w2, b2)
    jax.block_until_ready(out)

    ref = l2_tag_conv_ref(x, a_hat.astype(jnp.float32), w1, b1, w2, b2)
    assert out.shape == (N, OUT_C)
    assert bool(jnp.all(out >= 0.0))                         # ReLU output
    max_err = float(jnp.max(jnp.abs(out - ref)))
    assert max_err < 0.1, f"max abs err vs f32 reference: {max_err}"
    print("KERNEL_OK")
</pallas_src>

<mosaic_0001>
module attributes {stable_mosaic.version = 11 : i64} {
  func.func @kernel(%arg0: i32, %arg1: memref<32x32xbf16, #tpu.memory_space<vmem>>, %arg2: memref<32x16xbf16, #tpu.memory_space<vmem>>, %arg3: memref<64x512xbf16, #tpu.memory_space<vmem>>, %arg4: memref<1x512xf32, #tpu.memory_space<vmem>>, %arg5: memref<512x128xbf16, #tpu.memory_space<vmem>>, %arg6: memref<1x32xf32, #tpu.memory_space<vmem>>, %arg7: memref<32x32xf32, #tpu.memory_space<vmem>>, %arg8: memref<32x64xbf16, #tpu.memory_space<vmem>>) attributes {dimension_semantics = [#tpu.dimension_semantics<arbitrary>], iteration_bounds = array<i64: 1>, scalar_prefetch = 0 : i64, scratch_operands = 1 : i64, tpu.core_type = #tpu.core_type<tc>, window_params = [{pipeline_mode = #tpu.pipeline_mode<synchronous>, transform_indices = @transform_0, window_bounds = array<i64: 32, 32>}, {pipeline_mode = #tpu.pipeline_mode<synchronous>, transform_indices = @transform_1, window_bounds = array<i64: 32, 16>}, {pipeline_mode = #tpu.pipeline_mode<synchronous>, transform_indices = @transform_2, window_bounds = array<i64: 64, 512>}, {pipeline_mode = #tpu.pipeline_mode<synchronous>, transform_indices = @transform_3, window_bounds = array<i64: 1, 512>}, {pipeline_mode = #tpu.pipeline_mode<synchronous>, transform_indices = @transform_4, window_bounds = array<i64: 512, 128>}, {pipeline_mode = #tpu.pipeline_mode<synchronous>, transform_indices = @transform_5, window_bounds = array<i64: 1, 32>}, {pipeline_mode = #tpu.pipeline_mode<synchronous>, transform_indices = @transform_6, window_bounds = array<i64: 32, 32>}]} {
    %c0 = arith.constant 0 : index
    %c0_0 = arith.constant 0 : index
    %0 = vector.load %arg1[%c0, %c0_0] : memref<32x32xbf16, #tpu.memory_space<vmem>>, vector<32x32xbf16>
    %c0_1 = arith.constant 0 : index
    %c0_2 = arith.constant 0 : index
    %1 = vector.load %arg2[%c0_1, %c0_2] : memref<32x16xbf16, #tpu.memory_space<vmem>>, vector<32x16xbf16>
    %c0_3 = arith.constant 0 : index
    %c0_4 = arith.constant 0 : index
    %2 = vector.load %arg8[%c0_3, %c0_4] : memref<32x64xbf16, #tpu.memory_space<vmem>>, vector<32x16xbf16>
    tpu.vector_store %arg8[%c0_3, %c0_4], %1 {strides = array<i32>} : memref<32x64xbf16, #tpu.memory_space<vmem>>, vector<32x16xbf16>,
    %cst = arith.constant dense<0.000000e+00> : vector<32x16xf32>
    %3 = tpu.matmul %0, %1, %cst {dimension_numbers = #tpu.dot_dimension_numbers<[1], [0], [0], [1], [0, 0, 1, 1], [], []>} : vector<32x32xbf16>, vector<32x16xbf16>, vector<32x16xf32> -> vector<32x16xf32>
    %4 = arith.truncf %3 : vector<32x16xf32> to vector<32x16xbf16>
    %c0_5 = arith.constant 0 : index
    %c16 = arith.constant 16 : index
    %5 = vector.load %arg8[%c0_5, %c16] : memref<32x64xbf16, #tpu.memory_space<vmem>>, vector<32x16xbf16>
    tpu.vector_store %arg8[%c0_5, %c16], %4 {strides = array<i32>} : memref<32x64xbf16, #tpu.memory_space<vmem>>, vector<32x16xbf16>,
    %cst_6 = arith.constant dense<0.000000e+00> : vector<32x16xf32>
    %6 = tpu.matmul %0, %4, %cst_6 {dimension_numbers = #tpu.dot_dimension_numbers<[1], [0], [0], [1], [0, 0, 1, 1], [], []>} : vector<32x32xbf16>, vector<32x16xbf16>, vector<32x16xf32> -> vector<32x16xf32>
    %7 = arith.truncf %6 : vector<32x16xf32> to vector<32x16xbf16>
    %c0_7 = arith.constant 0 : index
    %c32 = arith.constant 32 : index
    %8 = vector.load %arg8[%c0_7, %c32] : memref<32x64xbf16, #tpu.memory_space<vmem>>, vector<32x16xbf16>
    tpu.vector_store %arg8[%c0_7, %c32], %7 {strides = array<i32>} : memref<32x64xbf16, #tpu.memory_space<vmem>>, vector<32x16xbf16>,
    %cst_8 = arith.constant dense<0.000000e+00> : vector<32x16xf32>
    %9 = tpu.matmul %0, %7, %cst_8 {dimension_numbers = #tpu.dot_dimension_numbers<[1], [0], [0], [1], [0, 0, 1, 1], [], []>} : vector<32x32xbf16>, vector<32x16xbf16>, vector<32x16xf32> -> vector<32x16xf32>
    %10 = arith.truncf %9 : vector<32x16xf32> to vector<32x16xbf16>
    %c0_9 = arith.constant 0 : index
    %c48 = arith.constant 48 : index
    %11 = vector.load %arg8[%c0_9, %c48] : memref<32x64xbf16, #tpu.memory_space<vmem>>, vector<32x16xbf16>
    tpu.vector_store %arg8[%c0_9, %c48], %10 {strides = array<i32>} : memref<32x64xbf16, #tpu.memory_space<vmem>>, vector<32x16xbf16>,
    %c0_10 = arith.constant 0 : index
    %c0_11 = arith.constant 0 : index
    %12 = vector.load %arg8[%c0_10, %c0_11] : memref<32x64xbf16, #tpu.memory_space<vmem>>, vector<32x64xbf16>
    %c0_12 = arith.constant 0 : index
    %c0_13 = arith.constant 0 : index
    %13 = vector.load %arg3[%c0_12, %c0_13] : memref<64x512xbf16, #tpu.memory_space<vmem>>, vector<64x512xbf16>
    %cst_14 = arith.constant dense<0.000000e+00> : vector<32x512xf32>
    %14 = tpu.matmul %12, %13, %cst_14 {dimension_numbers = #tpu.dot_dimension_numbers<[1], [0], [0], [1], [0, 0, 1, 1], [], []>} : vector<32x64xbf16>, vector<64x512xbf16>, vector<32x512xf32> -> vector<32x512xf32>
    %c0_15 = arith.constant 0 : index
    %c0_16 = arith.constant 0 : index
    %15 = vector.load %arg4[%c0_15, %c0_16] : memref<1x512xf32, #tpu.memory_space<vmem>>, vector<1x512xf32>
    %16 = vector.broadcast %15 : vector<1x512xf32> to vector<32x512xf32>
    %17 = arith.addf %14, %16 : vector<32x512xf32>
    %cst_17 = arith.constant 0.000000e+00 : f32
    %18 = vector.broadcast %cst_17 : f32 to vector<32x512xf32>
    %19 = arith.maximumf %17, %18 : vector<32x512xf32>
    %20 = arith.truncf %19 : vector<32x512xf32> to vector<32x512xbf16>
    %c0_18 = arith.constant 0 : index
    %c0_19 = arith.constant 0 : index
    %21 = vector.load %arg5[%c0_18, %c0_19] : memref<512x128xbf16, #tpu.memory_space<vmem>>, vector<512x128xbf16>
    %cst_20 = arith.constant dense<0.000000e+00> : vector<32x128xf32>
    %22 = tpu.matmul %20, %21, %cst_20 {dimension_numbers = #tpu.dot_dimension_numbers<[1], [0], [0], [1], [0, 0, 1, 1], [], []>} : vector<32x512xbf16>, vector<512x128xbf16>, vector<32x128xf32> -> vector<32x128xf32>
    %23 = vector.extract_strided_slice %22 {offsets = [0, 96], sizes = [32, 32], strides = [1, 1]} : vector<32x128xf32> to vector<32x32xf32>
    %24 = arith.truncf %23 : vector<32x32xf32> to vector<32x32xbf16>
    %cst_21 = arith.constant dense<0.000000e+00> : vector<32x32xf32>
    %25 = tpu.matmul %0, %24, %cst_21 {dimension_numbers = #tpu.dot_dimension_numbers<[1], [0], [0], [1], [0, 0, 1, 1], [], []>} : vector<32x32xbf16>, vector<32x32xbf16>, vector<32x32xf32> -> vector<32x32xf32>
    %26 = vector.extract_strided_slice %22 {offsets = [0, 64], sizes = [32, 32], strides = [1, 1]} : vector<32x128xf32> to vector<32x32xf32>
    %27 = arith.addf %26, %25 : vector<32x32xf32>
    %28 = arith.truncf %27 : vector<32x32xf32> to vector<32x32xbf16>
    %cst_22 = arith.constant dense<0.000000e+00> : vector<32x32xf32>
    %29 = tpu.matmul %0, %28, %cst_22 {dimension_numbers = #tpu.dot_dimension_numbers<[1], [0], [0], [1], [0, 0, 1, 1], [], []>} : vector<32x32xbf16>, vector<32x32xbf16>, vector<32x32xf32> -> vector<32x32xf32>
    %30 = vector.extract_strided_slice %22 {offsets = [0, 32], sizes = [32, 32], strides = [1, 1]} : vector<32x128xf32> to vector<32x32xf32>
    %31 = arith.addf %30, %29 : vector<32x32xf32>
    %32 = arith.truncf %31 : vector<32x32xf32> to vector<32x32xbf16>
    %cst_23 = arith.constant dense<0.000000e+00> : vector<32x32xf32>
    %33 = tpu.matmul %0, %32, %cst_23 {dimension_numbers = #tpu.dot_dimension_numbers<[1], [0], [0], [1], [0, 0, 1, 1], [], []>} : vector<32x32xbf16>, vector<32x32xbf16>, vector<32x32xf32> -> vector<32x32xf32>
    %34 = vector.extract_strided_slice %22 {offsets = [0, 0], sizes = [32, 32], strides = [1, 1]} : vector<32x128xf32> to vector<32x32xf32>
    %35 = arith.addf %34, %33 : vector<32x32xf32>
    %c0_24 = arith.constant 0 : index
    %c0_25 = arith.constant 0 : index
    %36 = vector.load %arg6[%c0_24, %c0_25] : memref<1x32xf32, #tpu.memory_space<vmem>>, vector<1x32xf32>
    %37 = vector.broadcast %36 : vector<1x32xf32> to vector<32x32xf32>
    %38 = arith.addf %35, %37 : vector<32x32xf32>
    %cst_26 = arith.constant 0.000000e+00 : f32
    %39 = vector.broadcast %cst_26 : f32 to vector<32x32xf32>
    %40 = arith.maximumf %38, %39 : vector<32x32xf32>
    %c0_27 = arith.constant 0 : index
    %c0_28 = arith.constant 0 : index
    %41 = vector.load %arg7[%c0_27, %c0_28] : memref<32x32xf32, #tpu.memory_space<vmem>>, vector<32x32xf32>
    tpu.vector_store %arg7[%c0_27, %c0_28], %40 {strides = array<i32>} : memref<32x32xf32, #tpu.memory_space<vmem>>, vector<32x32xf32>,
    return
  }
  func.func @transform_0(%arg0: i32) -> (i32, i32) {
    %c0_i32 = arith.constant 0 : i32
    %c0_i32_0 = arith.constant 0 : i32
    %c0_i32_1 = arith.constant 0 : i32
    return %c0_i32, %c0_i32_0 : i32, i32
  }
  func.func @transform_1(%arg0: i32) -> (i32, i32) {
    %c0_i32 = arith.constant 0 : i32
    %c0_i32_0 = arith.constant 0 : i32
    %c0_i32_1 = arith.constant 0 : i32
    return %c0_i32, %c0_i32_0 : i32, i32
  }
  func.func @transform_2(%arg0: i32) -> (i32, i32) {
    %c0_i32 = arith.constant 0 : i32
    %c0_i32_0 = arith.constant 0 : i32
    %c0_i32_1 = arith.constant 0 : i32
    return %c0_i32, %c0_i32_0 : i32, i32
  }
  func.func @transform_3(%arg0: i32) -> (i32, i32) {
    %c0_i32 = arith.constant 0 : i32
    %c0_i32_0 = arith.constant 0 : i32
    %c0_i32_1 = arith.constant 0 : i32
    return %c0_i32, %c0_i32_0 : i32, i32
  }
  func.func @transform_4(%arg0: i32) -> (i32, i32) {
    %c0_i32 = arith.constant 0 : i32
    %c0_i32_0 = arith.constant 0 : i32
    %c0_i32_1 = arith.constant 0 : i32
    return %c0_i32, %c0_i32_0 : i32, i32
  }
  func.func @transform_5(%arg0: i32) -> (i32, i32) {
    %c0_i32 = arith.constant 0 : i32
    %c0_i32_0 = arith.constant 0 : i32
    %c0_i32_1 = arith.constant 0 : i32
    return %c0_i32, %c0_i32_0 : i32, i32
  }
  func.func @transform_6(%arg0: i32) -> (i32, i32) {
    %c0_i32 = arith.constant 0 : i32
    %c0_i32_0 = arith.constant 0 : i32
    %c0_i32_1 = arith.constant 0 : i32
    return %c0_i32, %c0_i32_0 : i32, i32
  }
}

</mosaic_0001>

<bundles_post_ra>
// kernel: tpu_custom_call.1
= control target key start
LH: loop header
LB: loop body
LE: loop exit
PB: predicated region body
PF: predicated region fallthrough
CT: control target
= control target key end

     0   :  { %11 = vsyncpa [#allocation4], 0  ;;  %s1680_s0 = inlined_call_operand.vmem [shape: bf16[32,32], index: 0, kind: input, shape index: {}]   ;;  %s1681_s1 = inlined_call_operand.vmem [shape: bf16[32,16], index: 1, kind: input, shape index: {}]   ;;  %s1682_s2 = inlined_call_operand.hbm [shape: bf16[64,512], index: 2, kind: input, shape index: {}]   ;;  %s1683_s3 = inlined_call_operand.vmem [shape: f32[1,512], index: 3, kind: input, shape index: {}]   ;;  %s1684_s4 = inlined_call_operand.hbm [shape: bf16[512,128], index: 4, kind: input, shape index: {}]   ;;  %s1685_s5 = inlined_call_operand.vmem [shape: f32[1,32], index: 5, kind: input, shape index: {}]   ;;  %s1686_s6 = inlined_call_operand.hbm [shape: f32[32,32], index: 6, kind: output, shape index: {}]  }
   0x1   :  { %12 = vsyncpa [#allocation7], 0 }
   0x2   :  { %13 = vsyncpa [#allocation5], 0  ;;  %s1490_s21 = smov [#allocation3]   ;;  %s1418_s25 = scalar_lea.hbm %s1682_s2, 2048 }
   0x3   :  { %s23_s22 = sshll.u32 %s1490_s21, 4  ;;  %p1419_p0 = scmp.ne.s32.totalorder %s1682_s2, %s1418_s25  ;;  %s24_s22 = int_to_ptr.vmem [resolvable:$true] %s23_s22 }
   0x4   :  { %p1422_p1 = scmp.lt.u32.totalorder %s1418_s25, %s1682_s2 }
   0x6   :  { %p1424_p2 = pnand %p1422_p1, %p1419_p0 }
   0x8   :  { %1427 = shalt.err (!%p1424_p2)
}
   0x9   :  { %s1428_s30 = scalar_lea.vmem %s24_s22, 2048  ;;  %p1433_p4 = scmp.lt.s32.totalorder %s24_s22, %s24_s22 }
   0xa   :  { %p1429_p3 = scmp.ne.s32.totalorder %s24_s22, %s1428_s30  ;;  %p1434_p5 = scmp.lt.s32.totalorder %s1428_s30, %s1428_s30 }
   0xc   :  { %p1435_p6 = por %p1434_p5, %p1433_p4 }
   0xe   :  { %p1436_p7 = pnand %p1435_p6, %p1429_p3 }
  0x10   :  { %1439 = shalt.err (!%p1436_p7)
}
  0x11   :  { %s1491_s7 = smov 256   ;;  %s1492_s8 = smov 16  }
  0x12   :  { %29 = dma.hbm_to_vmem [thread:$0]  %s1682_s2, 2048, %s24_s22, [#allocation4], %s1491_s7, %s1491_s7, %s1492_s8  }
  0x13   :  { %s1493_s11 = smov [#allocation6]   ;;  %s1440_s15 = scalar_lea.hbm %s1684_s4, 4096 }
  0x14   :  { %s37_s12 = sshll.u32 %s1493_s11, 4  ;;  %p1441_p8 = scmp.ne.s32.totalorder %s1684_s4, %s1440_s15  ;;  %s38_s12 = int_to_ptr.vmem [resolvable:$true] %s37_s12 }
  0x15   :  { %p1444_p9 = scmp.lt.u32.totalorder %s1440_s15, %s1684_s4 }
  0x17   :  { %p1446_p10 = pnand %p1444_p9, %p1441_p8 }
  0x19   :  { %1449 = shalt.err (!%p1446_p10)
}
  0x1a   :  { %s1450_s20 = scalar_lea.vmem %s38_s12, 4096  ;;  %p1455_p12 = scmp.lt.s32.totalorder %s38_s12, %s38_s12 }
  0x1b   :  { %p1451_p11 = scmp.ne.s32.totalorder %s38_s12, %s1450_s20  ;;  %p1456_p13 = scmp.lt.s32.totalorder %s1450_s20, %s1450_s20 }
  0x1d   :  { %p1457_p0 = por %p1456_p13, %p1455_p12 }
  0x1f   :  { %p1458_p1 = pnand %p1457_p0, %p1451_p11 }
  0x21   :  { %1461 = shalt.err (!%p1458_p1)
}
  0x22   :  { %s1494_s2 = smov 64   ;;  %s1495_s21 = smov 4  }
  0x23   :  { %43 = dma.hbm_to_vmem [thread:$0]  %s1684_s4, 4096, %s38_s12, [#allocation7], %s1494_s2, %s1494_s2, %s1495_s21  }
  0x24   :  { %1484 = dma.done.wait [#allocation4], 2048  }
  0x25   :  { %1485 = vsyncadd [#allocation4], 4294965248 }
  0x26   :  { %1486 = dma.done.wait [#allocation7], 4096  }
  0x27   :  { %1487 = vsyncadd [#allocation7], 4294963200  ;;  %v1358_v0 = vld [vmem:[%s1681_s1] sm:$0xff]   ;;  %v1359_v1 = vld [vmem:[%s1681_s1 + $0x8] sm:$0xff]   ;;  %vm86_vm0 = vcmask 261120   ;;  %vm73_vm1 = vcmask 130048  }
  0x28   :  { %1297 = vmatprep.subr.bf16.mxu0 %v1358_v0  ;;  %v1574_v2 = vld [vmem:[%s1680_s0] sm:$0xff]   ;;  %v1581_v3 = vld [vmem:[%s1680_s0 + $0x8] sm:$0xff]   ;;  %74 = vst.msk [vmem:[#allocation2] sm:$0xff] %vm73_vm1, %v1358_v0  ;;  %75 = vst.msk [vmem:[#allocation2 + $0x8] sm:$0xff] %vm73_vm1, %v1359_v1  ;;  %vm152_vm2 = vcmask 261248   ;;  %s1496_s0 = smov 32  }
  0x29   :  { %1298 = vmatpush3.bf16.msra.mxu0 %v1358_v0  ;;  %1301 = vmatprep.mubr.msk.bf16.mxu0 %vm86_vm0, %v1574_v2  ;;  %v1362_v17 = vld [vmem:[#allocation3] ss:$16 sps:$4 sm:$0xff]   ;;  %v1364_v18 = vld [vmem:[#allocation3 + $0x4] ss:$16 sps:$4 sm:$0xff]   ;;  %v1365_v19 = vld [vmem:[#allocation3 + $0x8] ss:$16 sps:$4 sm:$0xff]  }
  0x2a   :  { %1299 = vmatprep.subr.bf16.mxu0 %v1359_v1  ;;  %1309 = vmatprep.mubr.msk.bf16.mxu1 %vm86_vm0, %v1574_v2  ;;  %v1367_v20 = vld [vmem:[#allocation3 + $0xc] ss:$16 sps:$4 sm:$0xff]   ;;  %v1370_v21 = vld [vmem:[#allocation3 + $0x24] ss:$16 sps:$4 sm:$0xff]   ;;  %v1368_v23 = vld [vmem:[#allocation3 + $0x20] ss:$16 sps:$4 sm:$0xff]  }
  0x2b   :  { %v1373_v22 = vld [vmem:[#allocation3 + $0x2c] ss:$16 sps:$4 sm:$0xff]   ;;  %v1371_v24 = vld [vmem:[#allocation3 + $0x28] ss:$16 sps:$4 sm:$0xff]   ;;  %vm214_vm3 = vcmask 392448   ;;  %v1497_v34 = vmov 0  }
  0x2c   :  { %v1376_v26 = vld [vmem:[#allocation3 + $0x44] ss:$16 sps:$4 sm:$0xff]   ;;  %v1379_v27 = vld [vmem:[#allocation3 + $0x4c] ss:$16 sps:$4 sm:$0xff]   ;;  %v1374_v28 = vld [vmem:[#allocation3 + $0x40] ss:$16 sps:$4 sm:$0xff]  }
  0x2d   :  { %1300 = vmatpush3.bf16.msra.mxu0 %v1359_v1  ;;  %v1377_v29 = vld [vmem:[#allocation3 + $0x48] ss:$16 sps:$4 sm:$0xff]   ;;  %v1382_v30 = vld [vmem:[#allocation3 + $0x64] ss:$16 sps:$4 sm:$0xff]   ;;  %v1385_v31 = vld [vmem:[#allocation3 + $0x6c] ss:$16 sps:$4 sm:$0xff]  }
  0x2e   :  { %v1380_v32 = vld [vmem:[#allocation3 + $0x60] ss:$16 sps:$4 sm:$0xff]   ;;  %v1383_v33 = vld [vmem:[#allocation3 + $0x68] ss:$16 sps:$4 sm:$0xff]   ;;  %s1498_s1 = smov 48   ;;  %vm276_vm4 = vcmask 523648  }
  0x2f   :  { %v1386_v41 = vld [vmem:[#allocation6 + $0x40] sm:$0xff]   ;;  %vm399_vm5 = vcmask 523264   ;;  %v1390_v50 = vld [vmem:[#allocation6 + $0x48] sm:$0xff]   ;;  %v1394_v54 = vld [vmem:[#allocation6 + $0x50] sm:$0xff]   ;;  %s1500_s11 = smov [#allocation8]  }
  0x30   :  { %1302 = vmatmul.mubr.msk.bf16.vlgmr.msra.gmra.mrb[0].mxu0 %vm86_vm0, %v1581_v3  ;;  %v1387_v42 = vld [vmem:[#allocation6 + $0xc0] sm:$0xff]   ;;  %v1391_v51 = vld [vmem:[#allocation6 + $0xc8] sm:$0xff]   ;;  %v1395_v55 = vld [vmem:[#allocation6 + $0xd0] sm:$0xff]   ;;  %s1135_s12 = sshll.u32 %s1500_s11, 4  ;;  %s1136_s12 = int_to_ptr.vmem [resolvable:$true] %s1135_s12 }
  0x31   :  { %1317 = vmatprep.mubr.msk.bf16.mxu0 %vm86_vm0, %v1574_v2  ;;  %v1388_v46 = vld [vmem:[#allocation6] sm:$0xff]   ;;  %v1392_v52 = vld [vmem:[#allocation6 + $0x8] sm:$0xff]   ;;  %v1396_v56 = vld [vmem:[#allocation6 + $0x10] sm:$0xff]   ;;  %p1467_p3 = scmp.lt.s32.totalorder %s1136_s12, %s1136_s12 }
  0x32   :  { %v1389_v47 = vld [vmem:[#allocation6 + $0x80] sm:$0xff]   ;;  %v1393_v53 = vld [vmem:[#allocation6 + $0x88] sm:$0xff]   ;;  %v1397_v57 = vld [vmem:[#allocation6 + $0x90] sm:$0xff]  }
  0x33   :  { %v1398_v59 = vld [vmem:[#allocation6 + $0x58] sm:$0xff]   ;;  %v1402_v63 = vld [vmem:[#allocation6 + $0x60] sm:$0xff]  }
  0x34   :  { %v1399_v60 = vld [vmem:[#allocation6 + $0xd8] sm:$0xff]   ;;  %v1403_v0 = vld [vmem:[#allocation6 + $0xe0] sm:$0xff]  }
  0x35   :  { %v1400_v61 = vld [vmem:[#allocation6 + $0x18] sm:$0xff]   ;;  %v1404_v1 = vld [vmem:[#allocation6 + $0x20] sm:$0xff]  }
  0x36   :  { %v1401_v62 = vld [vmem:[#allocation6 + $0x98] sm:$0xff]  }
 0x103   :  { %v1303_v4 = vpop.f32.mrb[0].mxu0 }
 0x104   :  { %v127_v5 = vpop.f32.mrb[1].mxu0 }
 0x105   :  { %v1304_v6 = vpop.f32.mrb[2].mxu0 }
 0x106   :  { %v1589_v7 = vpack.c.bf16 %v1304_v6, %v1303_v4  ;;  %v130_v8 = vpop.f32.mrb[3].mxu0  ;;  %v1405_v4 = vld [vmem:[#allocation6 + $0xa0] sm:$0xff]   ;;  %v1407_v6 = vld [vmem:[#allocation6 + $0xe8] sm:$0xff]  }
 0x107   :  { %v142_v9 = vpack.c.bf16 %v130_v8, %v127_v5  ;;  %v1406_v5 = vld [vmem:[#allocation6 + $0x68] sm:$0xff]  }
 0x108   :  { %v1409_v8 = vld [vmem:[#allocation6 + $0xa8] sm:$0xff]  }
 0x109   :  { %146 = vrot.lane.b32.xlu0 %v142_v9, %s1492_s8  ;;  %1305 = vmatprep.subr.bf16.mxu1 %v142_v9 }
 0x10a   :  { %1306 = vmatpush3.bf16.msra.mxu1 %v142_v9  ;;  %v1410_v9 = vld [vmem:[#allocation6 + $0x70] sm:$0xff]  }
 0x10b   :  { %1307 = vmatprep.subr.bf16.mxu1 %v1589_v7 }
 0x10e   :  { %1308 = vmatpush3.bf16.msra.mxu1 %v1589_v7 }
 0x10f   :  { %406 = vmatprep.subr.bf16.mxu1 %v1364_v18 }
 0x111   :  { %1310 = vmatmul.mubr.msk.bf16.vlgmr.msra.gmra.mrb[0].mxu1 %vm86_vm0, %v1581_v3 }
 0x112   :  { %407 = vmatpush1.bf16.msra.mxu1 %v1362_v17  ;;  %438 = vmatprep.mubr.bf16.mxu1 %v1497_v34  ;;  %v299_v17 = vlaneseq }
 0x113   :  { %408 = vmatprep.subr.bf16.mxu1 %v1370_v21  ;;  %v297_v21 = vld [vmem:[%s1683_s3] sm:$0xf]  ;;  %s1499_s3 = smov 96  }
 0x114   :  { %v300_v18 = vshrl.u32 %v299_v17, 7 }
 0x116   :  { %409 = vmatpush1.bf16.msra.mxu1 %v1368_v23  ;;  %v313_v23 = vsub.s32 3, %v300_v18 }
 0x117   :  { %410 = vmatprep.subr.bf16.mxu1 %v1376_v26 }
 0x11a   :  { %411 = vmatpush1.bf16.msra.mxu1 %v1374_v28 }
 0x11b   :  { %412 = vmatprep.subr.bf16.mxu1 %v1382_v30 }
 0x11e   :  { %413 = vmatpush1.bf16.msra.mxu1 %v1380_v32 }
 0x11f   :  { %1229 = vmatprep.subr.bf16.mxu1 %v1386_v41 }
 0x17b   :  { %v147_v10 = vpop.permute.xlu0 %146 }
 0x17c   :  { %153 = vst.msk [vmem:[#allocation2] sm:$0xff] %vm152_vm2, %v147_v10  ;;  %v1411_v10 = vld [vmem:[#allocation6 + $0xf0] sm:$0xff]  }
 0x1e4   :  { %v1311_v11 = vpop.f32.mrb[0].mxu1 }
 0x1e5   :  { %v189_v12 = vpop.f32.mrb[1].mxu1 }
 0x1e6   :  { %v1312_v13 = vpop.f32.mrb[2].mxu1 }
 0x1e7   :  { %v205_v14 = vpack.c.bf16 %v1312_v13, %v1311_v11  ;;  %v192_v15 = vpop.f32.mrb[3].mxu1  ;;  %v1412_v11 = vld [vmem:[#allocation6 + $0x30] sm:$0xff]   ;;  %v1414_v13 = vld [vmem:[#allocation6 + $0x78] sm:$0xff]  }
 0x1e8   :  { %v204_v16 = vpack.c.bf16 %v192_v15, %v189_v12  ;;  %v1413_v12 = vld [vmem:[#allocation6 + $0xb0] sm:$0xff]   ;;  %v1416_v15 = vld [vmem:[#allocation6 + $0x38] sm:$0xff]  }
 0x1ea   :  { %208 = vrot.lane.b32.xlu0 %v204_v16, %s1496_s0  ;;  %1313 = vmatprep.subr.bf16.mxu0 %v204_v16 }
 0x1eb   :  { %1314 = vmatpush3.bf16.msra.mxu0 %v204_v16  ;;  %v1417_v16 = vld [vmem:[#allocation6 + $0xb8] sm:$0xff]  }
 0x1ec   :  { %1315 = vmatprep.subr.bf16.mxu0 %v205_v14 }
 0x1ee   :  { %210 = vrot.lane.b32.xlu0 %v205_v14, %s1496_s0 }
 0x1ef   :  { %1316 = vmatpush3.bf16.msra.mxu0 %v205_v14  ;;  %v1415_v14 = vld [vmem:[#allocation6 + $0xf8] sm:$0xff]  }
 0x1f0   :  { %459 = vmatprep.subr.bf16.mxu0 %v1367_v20  ;;  %v309_v20 = vsub.s32 2, %v300_v18 }
 0x1f2   :  { %1318 = vmatmul.mubr.msk.bf16.vlgmr.msra.gmra.mrb[4].mxu0 %vm86_vm0, %v1581_v3 }
 0x1f3   :  { %460 = vmatpush1.bf16.msra.mxu0 %v1365_v19  ;;  %491 = vmatprep.mubr.bf16.mxu0 %v1497_v34  ;;  %v301_v19 = vsub.s32 0, %v300_v18 }
 0x1f4   :  { %461 = vmatprep.subr.bf16.mxu0 %v1373_v22  ;;  %v305_v22 = vsub.s32 1, %v300_v18 }
 0x1f6   :  { %v306_v26 = vrot.slane %v297_v21, %v305_v22 }
 0x1f7   :  { %462 = vmatpush1.bf16.msra.mxu0 %v1371_v24  ;;  %v302_v24 = vrot.slane %v297_v21, %v301_v19 }
 0x1f8   :  { %463 = vmatprep.subr.bf16.mxu0 %v1379_v27  ;;  %v314_v27 = vrot.slane %v297_v21, %v313_v23 }
 0x1fb   :  { %464 = vmatpush1.bf16.msra.mxu0 %v1377_v29 }
 0x1fc   :  { %465 = vmatprep.subr.bf16.mxu0 %v1385_v31 }
 0x1ff   :  { %466 = vmatpush1.bf16.msra.mxu0 %v1383_v33 }
 0x200   :  { %1257 = vmatprep.subr.bf16.mxu0 %v1387_v42 }
 0x25c   :  { %v209_v25 = vpop.permute.xlu0 %208 }
 0x25d   :  { %215 = vst.msk [vmem:[#allocation2] sm:$0xff] %vm214_vm3, %v209_v25  ;;  %v310_v25 = vrot.slane %v297_v21, %v309_v20 }
 0x260   :  { %v211_v45 = vpop.permute.xlu0 %210 }
 0x2c5   :  { %v1319_v35 = vpop.f32.mrb[4].mxu0 }
 0x2c6   :  { %v251_v36 = vpop.f32.mrb[5].mxu0 }
 0x2c7   :  { %v1320_v37 = vpop.f32.mrb[6].mxu0 }
 0x2c8   :  { %v267_v38 = vpack.c.bf16 %v1320_v37, %v1319_v35  ;;  %v254_v39 = vpop.f32.mrb[7].mxu0 }
 0x2c9   :  { %v266_v40 = vpack.c.bf16 %v254_v39, %v251_v36 }
 0x2cb   :  { %270 = vrot.lane.b32.xlu1 %v266_v40, %s1498_s1 }
 0x2cf   :  { %148 = vrot.lane.b32.xlu1 %v1589_v7, %s1492_s8  ;;  %v1408_v7 = vld [vmem:[#allocation6 + $0x28] sm:$0xff]  }
 0x2d3   :  { %272 = vrot.lane.b32.xlu1 %v267_v38, %s1498_s1 }
 0x33d   :  { %v271_v43 = vpop.permute.xlu1 %270 }
 0x33e   :  { %277 = vst.msk [vmem:[#allocation2] sm:$0xff] %vm276_vm4, %v271_v43 }
 0x341   :  { %v149_v44 = vpop.permute.xlu1 %148 }
 0x342   :  { %154 = vst.msk [vmem:[#allocation2 + $0x8] sm:$0xff] %vm152_vm2, %v149_v44 }
 0x343   :  { %216 = vst.msk [vmem:[#allocation2 + $0x8] sm:$0xff] %vm214_vm3, %v211_v45 }
 0x345   :  { %v273_v48 = vpop.permute.xlu1 %272  ;;  %v279_v49 = vld [vmem:[#allocation2] sm:$0xff] }
 0x346   :  { %278 = vst.msk [vmem:[#allocation2 + $0x8] sm:$0xff] %vm276_vm4, %v273_v48  ;;  %1174 = vmatmul.mubr.msk.bf16.vlgmr.msra.gmra.mrb[4].mxu1 %vm399_vm5, %v279_v49  ;;  %1176 = vmatmul.mubr.msk.bf16.vlgmr.msra.gmra.mrb[8].mxu0 %vm399_vm5, %v279_v49 }
 0x347   :  { %448 = vmatprep.mubr.bf16.mxu1 %v1497_v34  ;;  %501 = vmatprep.mubr.bf16.mxu0 %v1497_v34 }
 0x348   :  { %1230 = vmatpush3.bf16.msra.mxu1 %v1388_v46  ;;  %1258 = vmatpush3.bf16.msra.mxu0 %v1389_v47 }
 0x349   :  { %1231 = vmatprep.subr.bf16.mxu1 %v1390_v50  ;;  %1259 = vmatprep.subr.bf16.mxu0 %v1391_v51 }
 0x34c   :  { %1232 = vmatpush3.bf16.msra.mxu1 %v1392_v52  ;;  %1260 = vmatpush3.bf16.msra.mxu0 %v1393_v53 }
 0x34d   :  { %v280_v58 = vld [vmem:[#allocation2 + $0x8] sm:$0xff]  ;;  %1233 = vmatprep.subr.bf16.mxu1 %v1394_v54  ;;  %1261 = vmatprep.subr.bf16.mxu0 %v1395_v55 }
 0x34e   :  { %1175 = vmatmul.mubr.msk.bf16.gmra.mrb[8].mxu1 %vm399_vm5, %v280_v58  ;;  %1177 = vmatmul.mubr.msk.bf16.gmra.mrb[12].mxu0 %vm399_vm5, %v280_v58 }
 0x350   :  { %1234 = vmatpush3.bf16.msra.mxu1 %v1396_v56  ;;  %1262 = vmatpush3.bf16.msra.mxu0 %v1397_v57 }
 0x351   :  { %1235 = vmatprep.subr.bf16.mxu1 %v1398_v59  ;;  %1263 = vmatprep.subr.bf16.mxu0 %v1399_v60 }
 0x354   :  { %1236 = vmatpush3.bf16.msra.mxu1 %v1400_v61  ;;  %1264 = vmatpush3.bf16.msra.mxu0 %v1401_v62 }
 0x355   :  { %1237 = vmatprep.subr.bf16.mxu1 %v1402_v63  ;;  %1265 = vmatprep.subr.bf16.mxu0 %v1403_v0 }
 0x358   :  { %1238 = vmatpush3.bf16.msra.mxu1 %v1404_v1  ;;  %1266 = vmatpush3.bf16.msra.mxu0 %v1405_v4 }
 0x359   :  { %1239 = vmatprep.subr.bf16.mxu1 %v1406_v5  ;;  %1267 = vmatprep.subr.bf16.mxu0 %v1407_v6 }
 0x35c   :  { %1240 = vmatpush3.bf16.msra.mxu1 %v1408_v7  ;;  %1268 = vmatpush3.bf16.msra.mxu0 %v1409_v8 }
 0x35d   :  { %1241 = vmatprep.subr.bf16.mxu1 %v1410_v9  ;;  %1269 = vmatprep.subr.bf16.mxu0 %v1411_v10 }
 0x360   :  { %1242 = vmatpush3.bf16.msra.mxu1 %v1412_v11  ;;  %1270 = vmatpush3.bf16.msra.mxu0 %v1413_v12 }
 0x361   :  { %1243 = vmatprep.subr.bf16.mxu1 %v1414_v13  ;;  %1271 = vmatprep.subr.bf16.mxu0 %v1415_v14 }
 0x364   :  { %1244 = vmatpush3.bf16.msra.mxu1 %v1416_v15  ;;  %1272 = vmatpush3.bf16.msra.mxu0 %v1417_v16 }
 0x419   :  { %v440_v28 = vpop.f32.mrb[4].mxu1  ;;  %v493_v29 = vpop.f32.mrb[8].mxu0 }
 0x41a   :  { %v441_v30 = vadd.f32 %v440_v28, %v302_v24  ;;  %v494_v31 = vadd.f32 %v493_v29, %v310_v25  ;;  %v442_v32 = vpop.f32.mrb[5].mxu1  ;;  %v495_v33 = vpop.f32.mrb[9].mxu0 }
 0x41b   :  { %v443_v34 = vadd.f32 %v442_v32, %v306_v26  ;;  %v496_v35 = vadd.f32 %v495_v33, %v314_v27  ;;  %v444_v36 = vpop.f32.mrb[6].mxu1  ;;  %v497_v37 = vpop.f32.mrb[10].mxu0 }
 0x41c   :  { %v445_v38 = vadd.f32 %v444_v36, %v302_v24  ;;  %v498_v39 = vadd.f32 %v497_v37, %v310_v25  ;;  %v446_v40 = vpop.f32.mrb[7].mxu1  ;;  %v499_v41 = vpop.f32.mrb[11].mxu0  ;;  %v512_v44 = vmax.f32 %v441_v30, 0.0  ;;  %v514_v45 = vmax.f32 %v494_v31, 0.0 }
 0x41d   :  { %v447_v42 = vadd.f32 %v446_v40, %v306_v26  ;;  %v500_v43 = vadd.f32 %v499_v41, %v314_v27  ;;  %v513_v48 = vmax.f32 %v443_v34, 0.0  ;;  %v515_v49 = vmax.f32 %v496_v35, 0.0 }
 0x41e   :  { %v516_v46 = vmax.f32 %v445_v38, 0.0  ;;  %v518_v47 = vmax.f32 %v498_v39, 0.0 }
 0x41f   :  { %v517_v50 = vmax.f32 %v447_v42, 0.0  ;;  %v519_v51 = vmax.f32 %v500_v43, 0.0 }
 0x420   :  { %v528_v52 = vpack.c.bf16 %v516_v46, %v512_v44  ;;  %v530_v53 = vpack.c.bf16 %v518_v47, %v514_v45 }
 0x421   :  { %v529_v54 = vpack.c.bf16 %v517_v50, %v513_v48  ;;  %v531_v55 = vpack.c.bf16 %v519_v51, %v515_v49  ;;  %v450_v56 = vpop.f32.mrb[8].mxu1  ;;  %v503_v57 = vpop.f32.mrb[12].mxu0 }
 0x422   :  { %v451_v58 = vadd.f32 %v450_v56, %v302_v24  ;;  %v504_v59 = vadd.f32 %v503_v57, %v310_v25  ;;  %v452_v60 = vpop.f32.mrb[9].mxu1  ;;  %v505_v61 = vpop.f32.mrb[13].mxu0 }
 0x423   :  { %v453_v62 = vadd.f32 %v452_v60, %v306_v26  ;;  %v506_v63 = vadd.f32 %v505_v61, %v314_v27  ;;  %v454_v0 = vpop.f32.mrb[10].mxu1  ;;  %v507_v1 = vpop.f32.mrb[14].mxu0  ;;  %824 = vmatprep.mubr.bf16.mxu1 %v529_v54  ;;  %873 = vmatprep.mubr.bf16.mxu0 %v531_v55 }
 0x424   :  { %v455_v4 = vadd.f32 %v454_v0, %v302_v24  ;;  %v508_v5 = vadd.f32 %v507_v1, %v310_v25  ;;  %v456_v6 = vpop.f32.mrb[11].mxu1  ;;  %v509_v7 = vpop.f32.mrb[15].mxu0  ;;  %825 = vmatmul.mubr.bf16.vlgmr.msra.gmra.mrb[12].mxu1 %v528_v52  ;;  %874 = vmatmul.mubr.bf16.vlgmr.msra.gmra.mrb[16].mxu0 %v530_v53  ;;  %v520_v10 = vmax.f32 %v451_v58, 0.0  ;;  %v522_v11 = vmax.f32 %v504_v59, 0.0 }
 0x425   :  { %v457_v8 = vadd.f32 %v456_v6, %v306_v26  ;;  %v510_v9 = vadd.f32 %v509_v7, %v314_v27  ;;  %v521_v14 = vmax.f32 %v453_v62, 0.0  ;;  %v523_v15 = vmax.f32 %v506_v63, 0.0 }
 0x426   :  { %v524_v12 = vmax.f32 %v455_v4, 0.0  ;;  %v526_v13 = vmax.f32 %v508_v5, 0.0 }
 0x427   :  { %v525_v16 = vmax.f32 %v457_v8, 0.0  ;;  %v527_v17 = vmax.f32 %v510_v9, 0.0 }
 0x428   :  { %v532_v18 = vpack.c.bf16 %v524_v12, %v520_v10  ;;  %v534_v19 = vpack.c.bf16 %v526_v13, %v522_v11 }
 0x429   :  { %v533_v20 = vpack.c.bf16 %v525_v16, %v521_v14  ;;  %v535_v21 = vpack.c.bf16 %v527_v17, %v523_v15 }
 0x42b   :  { %832 = vmatprep.mubr.bf16.mxu1 %v533_v20  ;;  %881 = vmatprep.mubr.bf16.mxu0 %v535_v21 }
 0x42c   :  { %833 = vmatmul.mubr.bf16.gmra.mrb[16].mxu1 %v532_v18  ;;  %882 = vmatmul.mubr.bf16.gmra.mrb[20].mxu0 %v534_v19 }
 0x42d   :  { %1325 = vmatprep.mubr.msk.bf16.mxu1 %vm86_vm0, %v1574_v2  ;;  %1333 = vmatprep.mubr.msk.bf16.mxu0 %vm86_vm0, %v1574_v2 }
 0x4f7   :  { %v1245_v22 = vpop.f32.mrb[12].mxu1  ;;  %v1273_v23 = vpop.f32.mrb[16].mxu0 }
 0x4f8   :  { %v1246_v24 = vpop.f32.mrb[13].mxu1  ;;  %v1274_v25 = vpop.f32.mrb[17].mxu0 }
 0x4f9   :  { %v1247_v26 = vadd.f32 %v1246_v24, %v1245_v22  ;;  %v1275_v27 = vadd.f32 %v1274_v25, %v1273_v23  ;;  %v1248_v28 = vpop.f32.mrb[14].mxu1  ;;  %v1276_v29 = vpop.f32.mrb[18].mxu0  ;;  %v1216_v24 = vld [vmem:[%s1685_s5] ss:$0 sm:$0xff]  ;;  %s1462_s5 = scalar_lea.vmem %s1136_s12, 512 }
 0x4fa   :  { %v1249_v30 = vpop.f32.mrb[15].mxu1  ;;  %v1277_v31 = vpop.f32.mrb[19].mxu0  ;;  %p1463_p2 = scmp.ne.s32.totalorder %s1136_s12, %s1462_s5  ;;  %p1468_p4 = scmp.lt.s32.totalorder %s1462_s5, %s1462_s5 }
 0x4fb   :  { %v1617_v32 = vadd.f32 %v1275_v27, %v1247_v26  ;;  %v1250_v33 = vadd.f32 %v1249_v30, %v1248_v28  ;;  %v1278_v34 = vadd.f32 %v1277_v31, %v1276_v29 }
 0x4fc   :  { %p1469_p5 = por %p1468_p4, %p1467_p3 }
 0x4fd   :  { %v1619_v35 = vadd.f32 %v1278_v34, %v1250_v33 }
 0x4fe   :  { %p1470_p6 = pnand %p1469_p5, %p1463_p2 }
 0x4ff   :  { %v1251_v36 = vpop.f32.mrb[16].mxu1  ;;  %v1279_v37 = vpop.f32.mrb[20].mxu0  ;;  %v890_v38 = vpack.c.bf16 %v1619_v35, %v1617_v32 }
 0x500   :  { %v1252_v39 = vpop.f32.mrb[17].mxu1  ;;  %v1280_v40 = vpop.f32.mrb[21].mxu0 }
 0x501   :  { %v1253_v41 = vadd.f32 %v1252_v39, %v1251_v36  ;;  %v1281_v42 = vadd.f32 %v1280_v40, %v1279_v37  ;;  %v1282_v43 = vpop.f32.mrb[22].mxu0  ;;  %894 = vrot.lane.b32.xlu0 %v890_v38, %s1496_s0  ;;  %v1254_v44 = vpop.f32.mrb[18].mxu1 }
 0x502   :  { %v1255_v45 = vpop.f32.mrb[19].mxu1  ;;  %v1283_v46 = vpop.f32.mrb[23].mxu0 }
 0x503   :  { %v1624_v47 = vadd.f32 %v1281_v42, %v1253_v41  ;;  %v1256_v48 = vadd.f32 %v1255_v45, %v1254_v44  ;;  %v1284_v49 = vadd.f32 %v1283_v46, %v1282_v43 }
 0x505   :  { %v1626_v50 = vadd.f32 %v1284_v49, %v1256_v48 }
 0x507   :  { %v891_v51 = vpack.c.bf16 %v1626_v50, %v1624_v47 }
 0x509   :  { %896 = vrot.lane.b32.xlu1 %v891_v51, %s1496_s0 }
 0x573   :  { %v895_v52 = vpop.permute.xlu0 %894 }
 0x574   :  { %1321 = vmatprep.subr.bf16.mxu1 %v895_v52 }
 0x575   :  { %1322 = vmatpush3.bf16.msra.mxu1 %v895_v52 }
 0x57b   :  { %v897_v53 = vpop.permute.xlu1 %896 }
 0x57c   :  { %1323 = vmatprep.subr.bf16.mxu1 %v897_v53 }
 0x57d   :  { %1324 = vmatpush3.bf16.msra.mxu1 %v897_v53 }
 0x580   :  { %1326 = vmatmul.mubr.msk.bf16.vlgmr.msra.gmra.mrb[20].mxu1 %vm86_vm0, %v1581_v3 }
 0x581   :  { %1341 = vmatprep.mubr.msk.bf16.mxu1 %vm86_vm0, %v1574_v2 }
 0x653   :  { %v1327_v54 = vpop.f32.mrb[20].mxu1 }
 0x654   :  { %v934_v55 = vpop.f32.mrb[21].mxu1 }
 0x655   :  { %953 = vrot.lane.b32.xlu0 %v934_v55, %s1494_s2  ;;  %v1328_v56 = vpop.f32.mrb[22].mxu1 }
 0x656   :  { %v937_v57 = vpop.f32.mrb[23].mxu1 }
 0x657   :  { %955 = vrot.lane.b32.xlu1 %v937_v57, %s1494_s2 }
 0x659   :  { %957 = vrot.lane.b32.xlu0 %v1327_v54, %s1494_s2 }
 0x65b   :  { %959 = vrot.lane.b32.xlu1 %v1328_v56, %s1494_s2 }
 0x6c7   :  { %v954_v58 = vpop.permute.xlu0 %953 }
 0x6c8   :  { %v965_v60 = vadd.f32 %v954_v58, %v1617_v32 }
 0x6c9   :  { %v956_v59 = vpop.permute.xlu1 %955 }
 0x6ca   :  { %v966_v61 = vadd.f32 %v956_v59, %v1619_v35 }
 0x6cb   :  { %v958_v62 = vpop.permute.xlu0 %957 }
 0x6cc   :  { %v969_v2 = vpack.c.bf16 %v966_v61, %v965_v60  ;;  %v967_v0 = vadd.f32 %v958_v62, %v1624_v47 }
 0x6cd   :  { %v960_v63 = vpop.permute.xlu1 %959 }
 0x6ce   :  { %v968_v1 = vadd.f32 %v960_v63, %v1626_v50  ;;  %973 = vrot.lane.b32.xlu0 %v969_v2, %s1494_s2 }
 0x6d0   :  { %v970_v4 = vpack.c.bf16 %v968_v1, %v967_v0 }
 0x6d2   :  { %975 = vrot.lane.b32.xlu1 %v970_v4, %s1494_s2 }
 0x740   :  { %v974_v5 = vpop.permute.xlu0 %973 }
 0x741   :  { %1329 = vmatprep.subr.bf16.mxu0 %v974_v5 }
 0x742   :  { %1330 = vmatpush3.bf16.msra.mxu0 %v974_v5 }
 0x744   :  { %v976_v6 = vpop.permute.xlu1 %975 }
 0x745   :  { %1331 = vmatprep.subr.bf16.mxu0 %v976_v6 }
 0x746   :  { %1332 = vmatpush3.bf16.msra.mxu0 %v976_v6 }
 0x749   :  { %1334 = vmatmul.mubr.msk.bf16.vlgmr.msra.gmra.mrb[24].mxu0 %vm86_vm0, %v1581_v3 }
 0x81c   :  { %v1335_v7 = vpop.f32.mrb[24].mxu0 }
 0x81d   :  { %v1013_v8 = vpop.f32.mrb[25].mxu0 }
 0x81e   :  { %1032 = vrot.lane.b32.xlu0 %v1013_v8, %s1496_s0  ;;  %v1336_v9 = vpop.f32.mrb[26].mxu0 }
 0x81f   :  { %v1016_v10 = vpop.f32.mrb[27].mxu0 }
 0x820   :  { %1034 = vrot.lane.b32.xlu1 %v1016_v10, %s1496_s0 }
 0x822   :  { %1036 = vrot.lane.b32.xlu0 %v1335_v7, %s1496_s0 }
 0x824   :  { %1038 = vrot.lane.b32.xlu1 %v1336_v9, %s1496_s0 }
 0x890   :  { %v1033_v11 = vpop.permute.xlu0 %1032 }
 0x891   :  { %v1044_v13 = vadd.f32 %v1033_v11, %v1617_v32 }
 0x892   :  { %v1035_v12 = vpop.permute.xlu1 %1034 }
 0x893   :  { %v1045_v14 = vadd.f32 %v1035_v12, %v1619_v35 }
 0x894   :  { %v1037_v15 = vpop.permute.xlu0 %1036 }
 0x895   :  { %v1048_v16 = vpack.c.bf16 %v1045_v14, %v1044_v13  ;;  %v1046_v18 = vadd.f32 %v1037_v15, %v1624_v47 }
 0x896   :  { %v1039_v17 = vpop.permute.xlu1 %1038 }
 0x897   :  { %v1047_v19 = vadd.f32 %v1039_v17, %v1626_v50  ;;  %1052 = vrot.lane.b32.xlu0 %v1048_v16, %s1499_s3 }
 0x899   :  { %v1049_v20 = vpack.c.bf16 %v1047_v19, %v1046_v18 }
 0x89b   :  { %1054 = vrot.lane.b32.xlu1 %v1049_v20, %s1499_s3 }
 0x909   :  { %v1053_v21 = vpop.permute.xlu0 %1052 }
 0x90a   :  { %1337 = vmatprep.subr.bf16.mxu1 %v1053_v21 }
 0x90b   :  { %1338 = vmatpush3.bf16.msra.mxu1 %v1053_v21 }
 0x90d   :  { %v1055_v22 = vpop.permute.xlu1 %1054 }
 0x90e   :  { %1339 = vmatprep.subr.bf16.mxu1 %v1055_v22 }
 0x90f   :  { %1340 = vmatpush3.bf16.msra.mxu1 %v1055_v22 }
 0x912   :  { %1342 = vmatmul.mubr.msk.bf16.vlgmr.msra.gmra.mrb[24].mxu1 %vm86_vm0, %v1581_v3 }
 0x9e5   :  { %v1343_v23 = vpop.f32.mrb[24].mxu1 }
 0x9e6   :  { %v1109_v25 = vadd.f32 %v1343_v23, %v1624_v47  ;;  %v1092_v26 = vpop.f32.mrb[25].mxu1 }
 0x9e7   :  { %v1107_v27 = vadd.f32 %v1092_v26, %v1617_v32  ;;  %v1344_v28 = vpop.f32.mrb[26].mxu1 }
 0x9e8   :  { %v1120_v29 = vadd.f32 %v1216_v24, %v1109_v25  ;;  %v1110_v30 = vadd.f32 %v1344_v28, %v1626_v50  ;;  %v1095_v31 = vpop.f32.mrb[27].mxu1 }
 0x9e9   :  { %v1118_v33 = vadd.f32 %v1216_v24, %v1107_v27  ;;  %v1108_v34 = vadd.f32 %v1095_v31, %v1619_v35 }
 0x9ea   :  { %v1124_v3 = vmax.f32 %v1120_v29, 0.0  ;;  %v1121_v36 = vadd.f32 %v1216_v24, %v1110_v30 }
 0x9eb   :  { %v1122_v37 = vmax.f32 %v1118_v33, 0.0  ;;  %v1119_v38 = vadd.f32 %v1216_v24, %v1108_v34 }
 0x9ec   :  { %1128 = vst.msk [vmem:[#allocation8 + $0x10] sm:$0xff] %vm86_vm0, %v1124_v3  ;;  %v1125_v39 = vmax.f32 %v1121_v36, 0.0 }
 0x9ed   :  { %1126 = vst.msk [vmem:[#allocation8] sm:$0xff] %vm86_vm0, %v1122_v37  ;;  %v1123_v32 = vmax.f32 %v1119_v38, 0.0 }
 0x9ee   :  { %1129 = vst.msk [vmem:[#allocation8 + $0x18] sm:$0xff] %vm86_vm0, %v1125_v39 }
 0x9ef   :  { %1127 = vst.msk [vmem:[#allocation8 + $0x8] sm:$0xff] %vm86_vm0, %v1123_v32 }
 0x9f0   :  { %1473 = shalt.err (!%p1470_p6)
}
 0x9f1   :  { %s1474_s15 = scalar_lea.hbm %s1686_s6, 512 }
 0x9f2   :  { %p1475_p7 = scmp.ne.s32.totalorder %s1686_s6, %s1474_s15  ;;  %p1478_p8 = scmp.lt.u32.totalorder %s1474_s15, %s1686_s6 }
 0x9f4   :  { %p1480_p9 = pnand %p1478_p8, %p1475_p7 }
 0x9f6   :  { %1483 = shalt.err (!%p1480_p9)
}
 0x9f7   :  { %s1501_s20 = smov 128   ;;  %s1502_s2 = smov 8  }
 0x9f8   :  { %1141 = dma.vmem_to_hbm [thread:$0]  %s1136_s12, 512, %s1686_s6, [#allocation5], %s1501_s20, %s1501_s20, %s1502_s2  }
 0x9f9   :  { %1488 = dma.done.wait [#allocation5], 512  }
 0x9fa   :  { %1489 = vsyncadd [#allocation5], 4294966784 }
 0x9fb   :  { %1145 = vsyncpa [#allocation4], 1 }
 0x9fc   :  { %1146 = vsyncpa [#allocation7], 1 }
 0x9fd   :  { %1147 = vsyncpa [#allocation5], 1 }

</bundles_post_ra>
